<compile_context>
chip_gen: v6e
topology: v6e:2x2x1
jax: 0.10.0
libtpu: 0.0.40
codegen_flags: <defaults>
</compile_context>

<pallas_src>
import functools

import jax
import jax.numpy as jnp
from jax.experimental import pallas as pl
from jax.experimental.pallas import tpu as pltpu

# ----------------------------------------------------------------------------
# Filter pattern definitions (same numbers as the PyTorch module)
# ----------------------------------------------------------------------------
FILTER_PATTERNS = {
    "smooth":      [1.0, -0.5, 0.1, -0.02, 0.004, -0.0008, 0.00015],
    "butterworth": [1.0, -0.6, 0.2, -0.05, 0.01, -0.002, 0.0003],
    "gaussian":    [1.0, -0.7, 0.15, -0.03, 0.005, -0.0007, 8e-05],
    "golden_036":  [1.0, -0.36, 0.1296, -0.22, 0.1564, -0.088, 0.0548],
    "band_stop":   [1.0, -0.8, 0.3, -0.7, 0.4, -0.1, 0.05],
    "notch":       [1.0, -0.2, -0.3, 0.6, -0.4, 0.15, -0.05],
}

LANES = 128
MAX_TILE_ROWS = 2048  # 2048 x 128 x 4 B = 1 MiB per block (double-buffered in+out ~4 MiB)


def get_filter_coefficients(name, order=None):
    coeffs = list(FILTER_PATTERNS[name])
    if order is not None:
        if len(coeffs) > order + 1:
            coeffs = coeffs[: order + 1]
        elif len(coeffs) < order + 1:
            coeffs = coeffs + [0.0] * (order + 1 - len(coeffs))
    return jnp.asarray(coeffs, dtype=jnp.float32)


# ----------------------------------------------------------------------------
# Parameter setup (deterministic, mirrors EnhancedSpectralBasisFilter.__init__)
# ----------------------------------------------------------------------------
def init_params(filter_order=6, init_filter_name="smooth"):
    filter_names = ["golden_036", "smooth", "butterworth", "gaussian"]
    filter_bank = jnp.stack(
        [get_filter_coefficients(n, order=filter_order) for n in filter_names]
    )  # (4, filter_order+1)

    init_weights = jnp.ones((len(filter_names),), jnp.float32) * 0.25
    for i, name in enumerate(filter_names):
        if name == init_filter_name:
            init_weights = init_weights.at[i].set(0.4)
        elif name == "golden_036":
            init_weights = init_weights.at[i].set(0.3)
    init_weights = init_weights / jnp.sum(init_weights)

    return dict(
        filter_bank=filter_bank,
        mixing_weights=init_weights,
        refinement_coeffs=jnp.zeros((filter_order + 1,), jnp.float32),
        refinement_scale=jnp.float32(0.2),
        transform_scale=jnp.float32(1.0),
        transform_bias=jnp.float32(0.0),
    )


# ----------------------------------------------------------------------------
# Pallas kernel: Chebyshev spectral filter response on one (tile_rows, 128) tile
# ----------------------------------------------------------------------------
def _spectral_filter_kernel(scalars_ref, ev_ref, out_ref, *, n_coeffs):
    # scalars_ref: SMEM f32 [n_coeffs + 3] = [coeffs..., scale, bias, norm_a]
    # ev_ref / out_ref: VMEM (tile_rows, 128) sublane-dense tiles.
    ev = ev_ref[...]

    # Normalization folded into one scalar: x = a*ev - 1, a = 2/(max_ev+1e-8).
    a = scalars_ref[n_coeffs + 2]
    x = a * ev - 1.0
    x2 = x + x  # hoisted: Clenshaw uses 2x every step

    # Clenshaw recurrence for sum_k c_k T_k(x): 3 VALU ops per term.
    #   b_k = c_k + 2x*b_{k+1} - b_{k+2};  result = c_0 + x*b_1 - b_2
    b1 = jnp.full(x.shape, scalars_ref[n_coeffs - 1], dtype=x.dtype)
    b2 = jnp.zeros_like(x)
    for k in range(n_coeffs - 2, 0, -1):
        b1, b2 = scalars_ref[k] + x2 * b1 - b2, b1
    result = scalars_ref[0] + x * b1 - b2

    scale = scalars_ref[n_coeffs]
    bias = scalars_ref[n_coeffs + 1]
    result = scale * result + bias

    # exp stays on the EUP slot (free relative to VALU).
    out_ref[...] = (
        jnp.exp(jnp.maximum(-jnp.abs(result), -10.0)) + 1e-6
    ).astype(out_ref.dtype)


# ----------------------------------------------------------------------------
# Tiling plan: zero-copy when 1024-aligned, minimal vreg-granule pad otherwise
# ----------------------------------------------------------------------------
def _zero_copy_tile(rows):
    """Largest multiple-of-8 divisor of `rows` usable as tile_rows without
    padding. Requires >= 2 grid steps when rows > 8 (v7x megacore). Returns
    None when only pathologically small tiles divide rows."""
    if rows <= 8:
        return 8
    limit = min(MAX_TILE_ROWS, rows // 2)
    best = None
    d = 8
    while d <= limit:
        if rows % d == 0:
            best = d
        d += 8
    if best is None:
        return None
    grid_steps = rows // best
    if best >= 256 or grid_steps <= 64:
        return best
    return None  # fall back to padded path (tiles would be tiny)


def _plan_layout(n):
    """Return (rows_padded, tile_rows, needs_pad) for an n-element vector."""
    rows_min = pl.cdiv(n, LANES)
    rows_vreg = pl.cdiv(rows_min, 8) * 8  # 8x128 = 1024-element vreg granularity

    if n == rows_vreg * LANES:  # already 1024-aligned -> try zero-copy reshape
        tile = _zero_copy_tile(rows_vreg)
        if tile is not None:
            return rows_vreg, tile, False

    # Padding (copy) path: free to choose tile_rows; keep >= 2 grid steps
    # when there is more than one vreg row-group of work.
    if rows_vreg <= 8:
        tile = 8
    else:
        tile = max(8, min(MAX_TILE_ROWS, (rows_vreg // 2) // 8 * 8))
    rows_padded = pl.cdiv(rows_vreg, tile) * tile
    return rows_padded, tile, True


# ----------------------------------------------------------------------------
# Wrapper: coefficient mixing (tiny glue in plain JAX) + pallas_call
# ----------------------------------------------------------------------------
@functools.partial(jax.jit, static_argnames=("out_dtype",))
def enhanced_spectral_basis_filter(eigenvalues, params, out_dtype=jnp.float32):
    # Mix the filter bank (softmax-weighted) + tanh refinement — 7-element glue.
    weights = jax.nn.softmax(params["mixing_weights"], axis=0)          # (4,)
    mixed_coeffs = jnp.sum(weights[:, None] * params["filter_bank"], axis=0)
    refinement = params["refinement_scale"] * jnp.tanh(params["refinement_coeffs"])
    final_coeffs = (mixed_coeffs + refinement).astype(jnp.float32)      # (K,)
    n_coeffs = final_coeffs.shape[0]
    assert n_coeffs >= 2, "kernel requires filter_order >= 1 (at least 2 coefficients)"

    ev = eigenvalues.astype(jnp.float32)
    n = ev.shape[0]

    # Hoisted normalization scalar — computed on the UNPADDED vector.
    max_ev = jnp.max(ev) + 1e-8
    norm_a = 2.0 / max_ev

    # Pack all scalar parameters into one SMEM vector.
    scalars = jnp.concatenate(
        [
            final_coeffs,
            jnp.stack(
                [
                    jnp.asarray(params["transform_scale"], jnp.float32),
                    jnp.asarray(params["transform_bias"], jnp.float32),
                    norm_a.astype(jnp.float32),
                ]
            ),
        ]
    )

    rows_padded, tile_rows, needs_pad = _plan_layout(n)
    n_padded = rows_padded * LANES
    if needs_pad:
        # Minimal vreg-granule padding (only when N is not 1024-aligned).
        ev2d = jnp.pad(ev, (0, n_padded - n)).reshape(rows_padded, LANES)
    else:
        # Zero-copy: contiguous reshape, no extra HBM traffic.
        ev2d = ev.reshape(rows_padded, LANES)

    out = pl.pallas_call(
        functools.partial(_spectral_filter_kernel, n_coeffs=n_coeffs),
        out_shape=jax.ShapeDtypeStruct((rows_padded, LANES), out_dtype),
        grid_spec=pl.GridSpec(
            grid=(rows_padded // tile_rows,),
            in_specs=[
                pl.BlockSpec(memory_space=pltpu.MemorySpace.SMEM),       # scalars
                pl.BlockSpec((tile_rows, LANES), lambda i: (i, 0)),      # eigenvalues
            ],
            out_specs=pl.BlockSpec((tile_rows, LANES), lambda i: (i, 0)),
        ),
        compiler_params=pltpu.CompilerParams(
            dimension_semantics=("parallel",),
        ),
    )(scalars, ev2d)

    # Strip padding lanes (they flow through abs/exp harmlessly, then dropped).
    return out.reshape(n_padded)[:n]


# ----------------------------------------------------------------------------
# Pure-JAX reference (mirrors the PyTorch forward) for a sanity check
# ----------------------------------------------------------------------------
def reference_forward(eigenvalues, params):
    weights = jax.nn.softmax(params["mixing_weights"], axis=0)
    mixed = jnp.sum(weights[:, None] * params["filter_bank"], axis=0)
    final_coeffs = mixed + params["refinement_scale"] * jnp.tanh(
        params["refinement_coeffs"]
    )
    max_ev = jnp.max(eigenvalues) + 1e-8
    x = 2.0 * (eigenvalues / max_ev) - 1.0
    result = final_coeffs[0] * jnp.ones_like(x)
    t_prev, t_curr = jnp.ones_like(x), x
    result = result + final_coeffs[1] * t_curr
    for i in range(2, final_coeffs.shape[0]):
        t_next = 2.0 * x * t_curr - t_prev
        result = result + final_coeffs[i] * t_next
        t_prev, t_curr = t_curr, t_next
    result = params["transform_scale"] * result + params["transform_bias"]
    return jnp.exp(-jnp.minimum(jnp.abs(result), 10.0)) + 1e-6


if __name__ == "__main__":
    params = init_params(filter_order=6, init_filter_name="smooth")
    key = jax.random.PRNGKey(0)

    # N = 1000: not 1024-aligned -> exercises the minimal-padding path.
    ev_pad = jax.random.uniform(key, (1000,), jnp.float32, 0.0, 2.0)
    # N = 2048: 1024-aligned -> exercises the zero-copy path with 2 grid steps.
    ev_aligned = jax.random.uniform(
        jax.random.fold_in(key, 1), (2048,), jnp.float32, 0.0, 2.0
    )

    for ev in (ev_pad, ev_aligned):
        out = jax.block_until_ready(enhanced_spectral_basis_filter(ev, params))
        ref = reference_forward(ev, params)
        assert out.shape == ev.shape
        assert jnp.allclose(out, ref, rtol=1e-5, atol=2e-6), (
            float(jnp.max(jnp.abs(out - ref)))
        )

    print("KERNEL_OK")
</pallas_src>

<mosaic_0001>
module attributes {stable_mosaic.version = 11 : i64} {
  func.func @_spectral_filter_kernel(%arg0: i32, %arg1: memref<10xf32, #tpu.memory_space<smem>>, %arg2: memref<8x128xf32, #tpu.memory_space<vmem>>, %arg3: memref<8x128xf32, #tpu.memory_space<vmem>>) attributes {dimension_semantics = [#tpu.dimension_semantics<parallel>], iteration_bounds = array<i64: 1>, scalar_prefetch = 0 : i64, scratch_operands = 0 : i64, tpu.core_type = #tpu.core_type<tc>, window_params = [{transform_indices = @transform_0, window_bounds = array<i64: 10>}, {transform_indices = @transform_1, window_bounds = array<i64: 8, 128>}, {transform_indices = @transform_2, window_bounds = array<i64: 8, 128>}]} {
    %c0 = arith.constant 0 : index
    %c0_0 = arith.constant 0 : index
    %0 = vector.load %arg2[%c0, %c0_0] : memref<8x128xf32, #tpu.memory_space<vmem>>, vector<8x128xf32>
    %c9 = arith.constant 9 : index
    %1 = memref.load %arg1[%c9] : memref<10xf32, #tpu.memory_space<smem>>
    %2 = vector.broadcast %1 : f32 to vector<8x128xf32>
    %3 = arith.mulf %2, %0 : vector<8x128xf32>
    %cst = arith.constant 1.000000e+00 : f32
    %4 = vector.broadcast %cst : f32 to vector<8x128xf32>
    %5 = arith.subf %3, %4 : vector<8x128xf32>
    %6 = arith.addf %5, %5 : vector<8x128xf32>
    %c6 = arith.constant 6 : index
    %7 = memref.load %arg1[%c6] : memref<10xf32, #tpu.memory_space<smem>>
    %8 = vector.broadcast %7 : f32 to vector<8x128xf32>
    %cst_1 = arith.constant 0.000000e+00 : f32
    %9 = vector.broadcast %cst_1 : f32 to vector<8x128xf32>
    %c5 = arith.constant 5 : index
    %10 = memref.load %arg1[%c5] : memref<10xf32, #tpu.memory_space<smem>>
    %11 = arith.mulf %6, %8 : vector<8x128xf32>
    %12 = vector.broadcast %10 : f32 to vector<8x128xf32>
    %13 = arith.addf %12, %11 : vector<8x128xf32>
    %14 = arith.subf %13, %9 : vector<8x128xf32>
    %c4 = arith.constant 4 : index
    %15 = memref.load %arg1[%c4] : memref<10xf32, #tpu.memory_space<smem>>
    %16 = arith.mulf %6, %14 : vector<8x128xf32>
    %17 = vector.broadcast %15 : f32 to vector<8x128xf32>
    %18 = arith.addf %17, %16 : vector<8x128xf32>
    %19 = arith.subf %18, %8 : vector<8x128xf32>
    %c3 = arith.constant 3 : index
    %20 = memref.load %arg1[%c3] : memref<10xf32, #tpu.memory_space<smem>>
    %21 = arith.mulf %6, %19 : vector<8x128xf32>
    %22 = vector.broadcast %20 : f32 to vector<8x128xf32>
    %23 = arith.addf %22, %21 : vector<8x128xf32>
    %24 = arith.subf %23, %14 : vector<8x128xf32>
    %c2 = arith.constant 2 : index
    %25 = memref.load %arg1[%c2] : memref<10xf32, #tpu.memory_space<smem>>
    %26 = arith.mulf %6, %24 : vector<8x128xf32>
    %27 = vector.broadcast %25 : f32 to vector<8x128xf32>
    %28 = arith.addf %27, %26 : vector<8x128xf32>
    %29 = arith.subf %28, %19 : vector<8x128xf32>
    %c1 = arith.constant 1 : index
    %30 = memref.load %arg1[%c1] : memref<10xf32, #tpu.memory_space<smem>>
    %31 = arith.mulf %6, %29 : vector<8x128xf32>
    %32 = vector.broadcast %30 : f32 to vector<8x128xf32>
    %33 = arith.addf %32, %31 : vector<8x128xf32>
    %34 = arith.subf %33, %24 : vector<8x128xf32>
    %c0_2 = arith.constant 0 : index
    %35 = memref.load %arg1[%c0_2] : memref<10xf32, #tpu.memory_space<smem>>
    %36 = arith.mulf %5, %34 : vector<8x128xf32>
    %37 = vector.broadcast %35 : f32 to vector<8x128xf32>
    %38 = arith.addf %37, %36 : vector<8x128xf32>
    %39 = arith.subf %38, %29 : vector<8x128xf32>
    %c7 = arith.constant 7 : index
    %40 = memref.load %arg1[%c7] : memref<10xf32, #tpu.memory_space<smem>>
    %c8 = arith.constant 8 : index
    %41 = memref.load %arg1[%c8] : memref<10xf32, #tpu.memory_space<smem>>
    %42 = vector.broadcast %40 : f32 to vector<8x128xf32>
    %43 = arith.mulf %42, %39 : vector<8x128xf32>
    %44 = vector.broadcast %41 : f32 to vector<8x128xf32>
    %45 = arith.addf %43, %44 : vector<8x128xf32>
    %46 = math.absf %45 : vector<8x128xf32>
    %cst_3 = arith.constant 0.000000e+00 : f32
    %47 = vector.broadcast %cst_3 : f32 to vector<8x128xf32>
    %48 = arith.subf %47, %46 : vector<8x128xf32>
    %cst_4 = arith.constant -1.000000e+01 : f32
    %49 = vector.broadcast %cst_4 : f32 to vector<8x128xf32>
    %50 = arith.maximumf %48, %49 : vector<8x128xf32>
    %51 = math.exp %50 : vector<8x128xf32>
    %cst_5 = arith.constant 9.99999997E-7 : f32
    %52 = vector.broadcast %cst_5 : f32 to vector<8x128xf32>
    %53 = arith.addf %51, %52 : vector<8x128xf32>
    %c0_6 = arith.constant 0 : index
    %c0_7 = arith.constant 0 : index
    %54 = vector.load %arg3[%c0_6, %c0_7] : memref<8x128xf32, #tpu.memory_space<vmem>>, vector<8x128xf32>
    tpu.vector_store %arg3[%c0_6, %c0_7], %53 {strides = array<i32>} : memref<8x128xf32, #tpu.memory_space<vmem>>, vector<8x128xf32>,
    return
  }
  func.func @transform_0(%arg0: i32) -> i32 {
    %c0_i32 = arith.constant 0 : i32
    %c0_i32_0 = arith.constant 0 : i32
    return %c0_i32 : i32
  }
  func.func @transform_1(%arg0: i32) -> (i32, i32) {
    %c0_i32 = arith.constant 0 : i32
    %c0_i32_0 = arith.constant 0 : i32
    return %arg0, %c0_i32 : i32, i32
  }
  func.func @transform_2(%arg0: i32) -> (i32, i32) {
    %c0_i32 = arith.constant 0 : i32
    %c0_i32_0 = arith.constant 0 : i32
    return %arg0, %c0_i32 : i32, i32
  }
}

</mosaic_0001>

<bundles_post_ra>
// kernel: enhanced_spectral_basis_filter.1
= control target key start
LH: loop header
LB: loop body
LE: loop exit
PB: predicated region body
PF: predicated region fallthrough
CT: control target
= control target key end

     0   :  { %7 = vsyncpa [#allocation4], 0  ;;  %s166_s0 = inlined_call_operand.vmem [shape: f32[10], index: 0, kind: input, shape index: {}]   ;;  %s167_s1 = inlined_call_operand.vmem [shape: f32[8,128], index: 1, kind: input, shape index: {}]   ;;  %s168_s2 = inlined_call_operand.hbm [shape: f32[8,128], index: 2, kind: output, shape index: {}]  }
   0x1   :  { %8 = vsyncpa [#allocation3], 0  ;;  %s15_s11 = sshll.u32 %s166_s0, 4  ;;  %s16_s11 = int_to_ptr.vmem [resolvable:$true] %s15_s11 }
   0x2   :  { %s104_s12 = scalar_lea.vmem %s16_s11, 16  ;;  %p109_p1 = scmp.lt.s32.totalorder %s16_s11, %s16_s11 }
   0x3   :  { %p105_p0 = scmp.ne.s32.totalorder %s16_s11, %s104_s12  ;;  %p110_p2 = scmp.lt.s32.totalorder %s104_s12, %s104_s12 }
   0x5   :  { %p111_p3 = por %p110_p2, %p109_p1 }
   0x7   :  { %p112_p4 = pnand %p111_p3, %p105_p0 }
   0x9   :  { %115 = shalt.err (!%p112_p4)
}
   0xa   :  { %s140_s13 = smov [#allocation2]  }
   0xb   :  { %18 = dma.vmem_to_smem %s16_s11, 16, %s140_s13, [#allocation4]  }
   0xc   :  { %136 = dma.done.wait [#allocation4], 16  }
   0xd   :  { %137 = vsyncadd [#allocation4], 4294967280 }
   0xe   :  { %24 = sfence }
   0xf   :  { %s90_s14 = sld [smem:[#allocation2 + $0x9]]  ;;  %v25_v0 = vld [vmem:[%s167_s1] sm:$0xff]  ;;  %s141_s24 = smov [#allocation5]  }
  0x10   :  { %s92_s15 = sld [smem:[#allocation2 + $0x6]]  ;;  %s81_s25 = sshll.u32 %s141_s24, 4  ;;  %s82_s25 = int_to_ptr.vmem [resolvable:$true] %s81_s25 }
  0x11   :  { %s93_s0 = sld [smem:[#allocation2 + $0x5]]  ;;  %s116_s26 = scalar_lea.vmem %s82_s25, 128 }
  0x12   :  { %s94_s18 = sld [smem:[#allocation2 + $0x4]]  ;;  %p117_p5 = scmp.ne.s32.totalorder %s82_s25, %s116_s26 }
  0x13   :  { %s95_s19 = sld [smem:[#allocation2 + $0x3]]  ;;  %p121_p6 = scmp.lt.s32.totalorder %s82_s25, %s82_s25 }
  0x14   :  { %s96_s20 = sld [smem:[#allocation2 + $0x2]]  ;;  %p122_p7 = scmp.lt.s32.totalorder %s116_s26, %s116_s26 }
  0x15   :  { %v27_v1 = vstv %s90_s14  ;;  %s97_s1 = sld [smem:[#allocation2 + $0x1]] }
  0x16   :  { %v28_v2 = vmul.f32 %v27_v1, %v25_v0  ;;  %v32_v4 = vstv %s92_s15  ;;  %s57_s21 = sld [smem:[#allocation2]]  ;;  %p123_p8 = por %p122_p7, %p121_p6 }
  0x17   :  { %v35_v6 = vstv %s93_s0  ;;  %s98_s22 = sld [smem:[#allocation2 + $0x7]] }
  0x18   :  { %v91_v3 = vadd.f32 -1.0, %v28_v2  ;;  %v39_v9 = vstv %s94_s18  ;;  %s99_s23 = sld [smem:[#allocation2 + $0x8]]  ;;  %p124_p9 = pnand %p123_p8, %p117_p5 }
  0x19   :  { %v44_v13 = vstv %s95_s19 }
  0x1a   :  { %v30_v5 = vadd.f32 %v91_v3, %v91_v3  ;;  %v49_v17 = vstv %s96_s20 }
  0x1b   :  { %v54_v21 = vstv %s97_s1 }
  0x1c   :  { %v34_v7 = vmul.f32 %v32_v4, %v30_v5  ;;  %v59_v25 = vstv %s57_s21 }
  0x1d   :  { %v64_v28 = vstv %s98_s22 }
  0x1e   :  { %v36_v8 = vadd.f32 %v35_v6, %v34_v7  ;;  %v66_v30 = vstv %s99_s23 }
  0x20   :  { %v38_v10 = vmul.f32 %v36_v8, %v30_v5 }
  0x22   :  { %v40_v11 = vadd.f32 %v39_v9, %v38_v10 }
  0x24   :  { %v41_v12 = vsub.f32 %v40_v11, %v32_v4 }
  0x26   :  { %v43_v14 = vmul.f32 %v41_v12, %v30_v5 }
  0x28   :  { %v45_v15 = vadd.f32 %v44_v13, %v43_v14 }
  0x2a   :  { %v46_v16 = vsub.f32 %v45_v15, %v36_v8 }
  0x2c   :  { %v48_v18 = vmul.f32 %v46_v16, %v30_v5 }
  0x2e   :  { %v50_v19 = vadd.f32 %v49_v17, %v48_v18 }
  0x30   :  { %v51_v20 = vsub.f32 %v50_v19, %v41_v12 }
  0x32   :  { %v53_v22 = vmul.f32 %v51_v20, %v30_v5 }
  0x34   :  { %v55_v23 = vadd.f32 %v54_v21, %v53_v22 }
  0x36   :  { %v56_v24 = vsub.f32 %v55_v23, %v46_v16 }
  0x38   :  { %v58_v26 = vmul.f32 %v91_v3, %v56_v24 }
  0x3a   :  { %v60_v27 = vadd.f32 %v59_v25, %v58_v26 }
  0x3c   :  { %v61_v29 = vsub.f32 %v60_v27, %v51_v20 }
  0x3e   :  { %v65_v31 = vmul.f32 %v64_v28, %v61_v29 }
  0x40   :  { %v67_v32 = vadd.f32 %v66_v30, %v65_v31 }
  0x42   :  { %v68_v33 = vand.u32 2147483647, %v67_v32 }
  0x44   :  { %v69_v34 = vsub.f32 0.0, %v68_v33 }
  0x46   :  { %v70_v35 = vmax.f32 %v69_v34, -10.0 }
  0x48   :  { %v71_v36 = vmul.f32 1.442695, %v70_v35 }
  0x4a   :  { %102 = vpow2.f32 %v71_v36 }
  0x57   :  { %v103_v37 = vpop.eup %102 }
  0x58   :  { %v73_v38 = vadd.f32 1e-06, %v103_v37 }
  0x5a   :  { %74 = vst [vmem:[#allocation5] sm:$0xff] %v73_v38 }
  0x5b   :  { %127 = shalt.err (!%p124_p9)
}
  0x5c   :  { %84 = dma.vmem_to_hbm [thread:$0]  %s82_s25, 128, %s168_s2, [#allocation3]  }
  0x5d   :  { %138 = dma.done.wait [#allocation3], 128  }
  0x5e   :  { %139 = vsyncadd [#allocation3], 4294967168 }
  0x5f   :  { %88 = vsyncpa [#allocation3], 1 }
  0x60   :  { %89 = vsyncpa [#allocation4], 1 }

</bundles_post_ra>
